<compile_context>
chip_gen: v5e
topology: v5e:2x2
jax: 0.10.0
libtpu: 0.0.40
codegen_flags: <defaults>
</compile_context>

<pallas_src>
import jax
import jax.numpy as jnp
from jax import lax
from jax.experimental import pallas as pl
from jax.experimental.pallas import tpu as pltpu


# ----------------------------------------------------------------------------
# Scaled-down replica of vgg19.features indices 0..11 (same conv/relu/pool
# order as torchvision VGG19; channel counts reduced to 8/16/32).
# ----------------------------------------------------------------------------
VGG_CFG = [
    ("conv", 3, 8),    # 0  conv1_1
    ("relu",),         # 1
    ("conv", 8, 8),    # 2  conv1_2
    ("relu",),         # 3
    ("pool",),         # 4
    ("conv", 8, 16),   # 5  conv2_1
    ("relu",),         # 6
    ("conv", 16, 16),  # 7  conv2_2
    ("relu",),         # 8
    ("pool",),         # 9
    ("conv", 16, 32),  # 10 conv3_1
    ("relu",),         # 11
]

# Same convention as the PyTorch module: {feature_name: str(vgg_layer_index)}
LAYERS = {"relu1_1": "1", "relu2_1": "6", "relu3_1": "11"}


def init_params(key, cfg):
    params = {}
    for idx, op in enumerate(cfg):
        if op[0] == "conv":
            _, cin, cout = op
            key, kw_, kb = jax.random.split(key, 3)
            w = jax.random.normal(kw_, (3, 3, cin, cout), jnp.float32)
            w = w * (2.0 / (9.0 * cin)) ** 0.5
            b = jax.random.normal(kb, (cout,), jnp.float32) * 0.01
            params[idx] = (w, b)
    return params


def _toeplitz_weights(w_hwio, *, w_out, w_in_row, in_stride):
    """HWIO (3,3,Cin,Cout) -> (3*w_in_row*Cin, w_out*Cout) block-Toeplitz matrix.

    "Same" padding in W and the pooled-input stride are folded in as structural
    zeros, and the three kernel rows (dh) are concatenated along K so each conv
    is a single matmul:

        out[h, w*Cout + co] = X3[h, :] @ B
        X3[h, :]            = [x[h-1, :], x[h, :], x[h+1, :]]   (zero rows OOB)
        B[dh*w_in_row*Cin + q*Cin + ci, w*Cout + co]
            = w_hwio[dh, dw, ci, co]   where q == in_stride*(w + dw - 1)
                                       and 0 <= w + dw - 1 < w_out,  else 0.

    in_stride = 2 lets a conv consume a "width-expanded" pooled activation
    (valid values at even width blocks) without any lane compaction.
    """
    kh, kw, cin, cout = w_hwio.shape
    k = jnp.arange(kw)[:, None, None]          # dw
    q = jnp.arange(w_in_row)[None, :, None]    # stored input width position
    w = jnp.arange(w_out)[None, None, :]       # output width position
    src = w + k - (kw // 2)                    # logical input width position
    hit = (q == in_stride * src) & (src >= 0) & (src < w_out)
    onehot = hit.astype(w_hwio.dtype)                      # (kw, w_in_row, w_out)
    B = jnp.einsum("kqw,hkic->hqiwc", onehot, w_hwio)      # (kh,w_in_row,cin,w_out,cout)
    return B.reshape(kh * w_in_row * cin, w_out * cout)


# ----------------------------------------------------------------------------
# Module replica
# ----------------------------------------------------------------------------
class VGGFeatureExtractorPallas:
    """Mirrors VGGFeatureExtractor.forward: {name: NCHW f32 feature map}."""

    def __init__(self, layers, cfg=VGG_CFG, key=None, in_hw=(16, 16), in_ch=3):
        if key is None:
            key = jax.random.PRNGKey(0)
        self.layers = dict(layers)
        self.cfg = list(cfg)
        self.in_hw = in_hw
        self.in_ch = in_ch
        self.params = init_params(key, self.cfg)          # raw conv weights
        self._build_program(in_hw[0], in_hw[1], in_ch)
        # Precompute Toeplitz weights (bf16) + tiled biases (f32) ONCE at init.
        self.prepped = self._prep_params()
        self._forward = jax.jit(self._forward_impl)

    # ---- static plan of the fused kernel --------------------------------
    def _build_program(self, H, W, C):
        emit_after = {int(v): slot for slot, v in enumerate(self.layers.values())}
        last = max(emit_after)
        program, conv_meta = [], []
        feat_shapes = [None] * len(emit_after)
        h, w, c, w_row = H, W, C, W                       # w_row: stored width/row
        i = 0
        while i <= last:
            kind = self.cfg[i][0]
            if kind == "conv":
                _, cin, cout = self.cfg[i]
                assert c == cin, "channel mismatch in cfg"
                fuse = (i not in emit_after) and (i + 1 <= last) \
                    and self.cfg[i + 1][0] == "relu"
                conv_meta.append(dict(cfg_idx=i, w_out=w, w_in_row=w_row,
                                      in_stride=w_row // w, cin=cin, cout=cout))
                emit = emit_after.get(i + 1) if fuse else emit_after.get(i)
                program.append(dict(kind="conv", conv=len(conv_meta) - 1,
                                    relu=fuse, emit=emit))
                c, w_row = cout, w
                if emit is not None:
                    feat_shapes[emit] = (h, w, c)
                i += 2 if fuse else 1
            elif kind == "relu":
                emit = emit_after.get(i)
                program.append(dict(kind="relu", emit=emit))
                if emit is not None:
                    feat_shapes[emit] = (h, w, c)
                i += 1
            elif kind == "pool":
                # TODO(synk): a feature tap right after a MaxPool would need a
                # lane compaction of the width-expanded activation; not needed
                # for the default LAYERS (features sit on ReLU outputs).
                assert emit_after.get(i) is None, "feature after pool unsupported"
                assert w_row == w, "consecutive pools unsupported"
                assert h % 2 == 0 and w % 2 == 0
                program.append(dict(kind="pool", c=c, emit=None))
                h, w = h // 2, w // 2                     # w_row stays = 2*w (expanded)
                i += 1
            else:
                raise ValueError(self.cfg[i])
        self.program = program
        self.conv_meta = conv_meta
        self.feat_shapes = feat_shapes

    def _prep_params(self):
        wts, bts = [], []
        for m in self.conv_meta:
            w, b = self.params[m["cfg_idx"]]
            wt = _toeplitz_weights(w, w_out=m["w_out"], w_in_row=m["w_in_row"],
                                   in_stride=m["in_stride"]).astype(jnp.bfloat16)
            bt = jnp.tile(b.astype(jnp.float32),
                          m["w_out"]).reshape(1, m["w_out"] * m["cout"])
            wts.append(wt)
            bts.append(bt)
        return tuple(wts), tuple(bts)

    # ---- fused kernel ----------------------------------------------------
    def _make_kernel(self):
        program = self.program
        n_conv = len(self.conv_meta)

        def kernel(*refs):
            x_ref = refs[0]
            wb = refs[1:1 + 2 * n_conv]
            outs = refs[1 + 2 * n_conv:]
            act = x_ref[0]                                # (H0, W0*C0) bf16
            for st in program:
                if st["kind"] == "conv":
                    w_ref = wb[2 * st["conv"]]
                    b_ref = wb[2 * st["conv"] + 1]
                    x = act.astype(jnp.bfloat16)          # single downcast
                    hh, ll = x.shape
                    z = jnp.zeros((1, ll), jnp.bfloat16)
                    prev = jnp.concatenate([z, x[:hh - 1, :]], axis=0)
                    nxt = jnp.concatenate([x[1:, :], z], axis=0)
                    x3 = jnp.concatenate([prev, x, nxt], axis=1)  # (H, 3*L)
                    acc = jnp.dot(x3, w_ref[...],
                                  preferred_element_type=jnp.float32)
                    acc = acc + b_ref[...]                # f32 bias
                    if st["relu"]:
                        acc = jnp.maximum(acc, 0.0)       # fused ReLU (f32)
                    act = acc
                elif st["kind"] == "relu":
                    act = jnp.maximum(act, 0.0)
                else:  # pool (kept width-expanded; next conv uses stride-2 Toeplitz)
                    cc = st["c"]
                    hh, _ = act.shape
                    shifted = jnp.concatenate(
                        [act[:, cc:], jnp.zeros((hh, cc), act.dtype)], axis=1)
                    m = jnp.maximum(act, shifted)         # W-pair max @ even blocks
                    # H-pair max, unrolled over <=8 static row pairs (avoids a
                    # sublane-splitting value reshape; trivially cheap here).
                    rows = [jnp.maximum(m[r:r + 1, :], m[r + 1:r + 2, :])
                            for r in range(0, hh, 2)]
                    act = jnp.concatenate(rows, axis=0)
                if st["emit"] is not None:
                    outs[st["emit"]][0] = act.astype(outs[st["emit"]].dtype)

        return kernel

    def _fused_call(self, x_flat, wts, bts):
        N, H0, L0 = x_flat.shape
        in_specs = [pl.BlockSpec((1, H0, L0), lambda n: (n, 0, 0))]
        inputs = [x_flat]
        for wt, bt in zip(wts, bts):
            # Constant index_map -> loaded once across the grid.
            in_specs.append(pl.BlockSpec(wt.shape, lambda n: (0, 0)))
            in_specs.append(pl.BlockSpec(bt.shape, lambda n: (0, 0)))
            inputs.extend([wt, bt])
        out_shapes, out_specs = [], []
        for fh, fw, fc in self.feat_shapes:
            out_shapes.append(jax.ShapeDtypeStruct((N, fh, fw * fc), jnp.float32))
            out_specs.append(pl.BlockSpec((1, fh, fw * fc), lambda n: (n, 0, 0)))
        return pl.pallas_call(
            self._make_kernel(),
            out_shape=tuple(out_shapes),
            grid=(N,),
            in_specs=in_specs,
            out_specs=out_specs,
            compiler_params=pltpu.CompilerParams(
                dimension_semantics=("parallel",)),   # v7x: 2 TCs split the batch
        )(*inputs)

    # ---- public forward ---------------------------------------------------
    def _forward_impl(self, x_nchw, prepped):
        wts, bts = prepped
        N, C, H, W = x_nchw.shape
        # Public layout is NCHW (PyTorch); the kernel runs flattened NHWC.
        x = jnp.transpose(x_nchw, (0, 2, 3, 1)).reshape(N, H, W * C)
        feats_flat = self._fused_call(x.astype(jnp.bfloat16), wts, bts)
        out = {}
        for name, (fh, fw, fc), f in zip(self.layers.keys(), self.feat_shapes,
                                         feats_flat):
            out[name] = jnp.transpose(f.reshape(N, fh, fw, fc), (0, 3, 1, 2))
        return out

    def __call__(self, x_nchw):
        return self._forward(x_nchw, self.prepped)


# ----------------------------------------------------------------------------
# Pure-JAX f32 reference (for a tolerance check against the bf16 kernel)
# ----------------------------------------------------------------------------
def _reference_forward(x_nchw, params, cfg, layers):
    x = jnp.transpose(x_nchw, (0, 2, 3, 1))                 # NHWC f32
    names = list(layers.keys())
    ends = [int(v) for v in layers.values()]
    emit = dict(zip(ends, names))
    feats = {}
    for idx in range(max(ends) + 1):
        op = cfg[idx]
        if op[0] == "conv":
            w, b = params[idx]
            x = lax.conv_general_dilated(
                x, w, window_strides=(1, 1), padding="SAME",
                dimension_numbers=("NHWC", "HWIO", "NHWC")) + b
        elif op[0] == "relu":
            x = jnp.maximum(x, 0.0)
        else:  # pool
            n, h, w_, c = x.shape
            x = jnp.max(x.reshape(n, h // 2, 2, w_ // 2, 2, c), axis=(2, 4))
        if idx in emit:
            feats[emit[idx]] = jnp.transpose(x, (0, 3, 1, 2))
    return feats


if __name__ == "__main__":
    key = jax.random.PRNGKey(0)
    kx, kp = jax.random.split(key)
    x = jax.random.normal(kx, (2, 3, 16, 16), jnp.float32)   # NCHW, like PyTorch
    model = VGGFeatureExtractorPallas(LAYERS, key=kp)
    feats = model(x)
    feats = jax.block_until_ready(feats)

    assert feats["relu1_1"].shape == (2, 8, 16, 16)
    assert feats["relu2_1"].shape == (2, 16, 8, 8)
    assert feats["relu3_1"].shape == (2, 32, 4, 4)
    assert all(bool(jnp.isfinite(v).all()) for v in feats.values())

    # Tolerance check vs an f32 lax.conv reference (kernel uses bf16 matmuls).
    ref = _reference_forward(x, model.params, model.cfg, model.layers)
    for name in feats:
        a, b = feats[name], ref[name]
        err = float(jnp.max(jnp.abs(a - b)) / (jnp.max(jnp.abs(b)) + 1e-6))
        assert err < 5e-2, (name, err)

    print("KERNEL_OK")
</pallas_src>

<mosaic_0001>
module attributes {stable_mosaic.version = 11 : i64} {
  func.func @kernel(%arg0: i32, %arg1: memref<1x16x48xbf16, #tpu.memory_space<vmem>>, %arg2: memref<144x128xbf16, #tpu.memory_space<vmem>>, %arg3: memref<1x128xf32, #tpu.memory_space<vmem>>, %arg4: memref<384x128xbf16, #tpu.memory_space<vmem>>, %arg5: memref<1x128xf32, #tpu.memory_space<vmem>>, %arg6: memref<384x128xbf16, #tpu.memory_space<vmem>>, %arg7: memref<1x128xf32, #tpu.memory_space<vmem>>, %arg8: memref<384x128xbf16, #tpu.memory_space<vmem>>, %arg9: memref<1x128xf32, #tpu.memory_space<vmem>>, %arg10: memref<384x128xbf16, #tpu.memory_space<vmem>>, %arg11: memref<1x128xf32, #tpu.memory_space<vmem>>, %arg12: memref<1x16x128xf32, #tpu.memory_space<vmem>>, %arg13: memref<1x8x128xf32, #tpu.memory_space<vmem>>, %arg14: memref<1x4x128xf32, #tpu.memory_space<vmem>>) attributes {dimension_semantics = [#tpu.dimension_semantics<parallel>], iteration_bounds = array<i64: 2>, scalar_prefetch = 0 : i64, scratch_operands = 0 : i64, tpu.core_type = #tpu.core_type<tc>, window_params = [{transform_indices = @transform_0, window_bounds = array<i64: 1, 16, 48>}, {pipeline_mode = #tpu.pipeline_mode<synchronous>, transform_indices = @transform_1, window_bounds = array<i64: 144, 128>}, {pipeline_mode = #tpu.pipeline_mode<synchronous>, transform_indices = @transform_2, window_bounds = array<i64: 1, 128>}, {pipeline_mode = #tpu.pipeline_mode<synchronous>, transform_indices = @transform_3, window_bounds = array<i64: 384, 128>}, {pipeline_mode = #tpu.pipeline_mode<synchronous>, transform_indices = @transform_4, window_bounds = array<i64: 1, 128>}, {pipeline_mode = #tpu.pipeline_mode<synchronous>, transform_indices = @transform_5, window_bounds = array<i64: 384, 128>}, {pipeline_mode = #tpu.pipeline_mode<synchronous>, transform_indices = @transform_6, window_bounds = array<i64: 1, 128>}, {pipeline_mode = #tpu.pipeline_mode<synchronous>, transform_indices = @transform_7, window_bounds = array<i64: 384, 128>}, {pipeline_mode = #tpu.pipeline_mode<synchronous>, transform_indices = @transform_8, window_bounds = array<i64: 1, 128>}, {pipeline_mode = #tpu.pipeline_mode<synchronous>, transform_indices = @transform_9, window_bounds = array<i64: 384, 128>}, {pipeline_mode = #tpu.pipeline_mode<synchronous>, transform_indices = @transform_10, window_bounds = array<i64: 1, 128>}, {transform_indices = @transform_11, window_bounds = array<i64: 1, 16, 128>}, {transform_indices = @transform_12, window_bounds = array<i64: 1, 8, 128>}, {transform_indices = @transform_13, window_bounds = array<i64: 1, 4, 128>}]} {
    %c0 = arith.constant 0 : index
    %c0_0 = arith.constant 0 : index
    %c0_1 = arith.constant 0 : index
    %0 = vector.load %arg1[%c0, %c0_0, %c0_1] : memref<1x16x48xbf16, #tpu.memory_space<vmem>>, vector<1x16x48xbf16>
    %1 = vector.shape_cast %0 : vector<1x16x48xbf16> to vector<16x48xbf16>
    %cst = arith.constant 0.000000e+00 : bf16
    %2 = vector.broadcast %cst : bf16 to vector<1x48xbf16>
    %3 = vector.extract_strided_slice %1 {offsets = [0, 0], sizes = [15, 48], strides = [1, 1]} : vector<16x48xbf16> to vector<15x48xbf16>
    %4 = tpu.concatenate %2, %3 in 0 : vector<1x48xbf16>, vector<15x48xbf16> -> vector<16x48xbf16>
    %5 = vector.extract_strided_slice %1 {offsets = [1, 0], sizes = [15, 48], strides = [1, 1]} : vector<16x48xbf16> to vector<15x48xbf16>
    %6 = tpu.concatenate %5, %2 in 0 : vector<15x48xbf16>, vector<1x48xbf16> -> vector<16x48xbf16>
    %7 = tpu.concatenate %4, %1, %6 in 1 : vector<16x48xbf16>, vector<16x48xbf16>, vector<16x48xbf16> -> vector<16x144xbf16>
    %c0_2 = arith.constant 0 : index
    %c0_3 = arith.constant 0 : index
    %8 = vector.load %arg2[%c0_2, %c0_3] : memref<144x128xbf16, #tpu.memory_space<vmem>>, vector<144x128xbf16>
    %cst_4 = arith.constant dense<0.000000e+00> : vector<16x128xf32>
    %9 = tpu.matmul %7, %8, %cst_4 {dimension_numbers = #tpu.dot_dimension_numbers<[1], [0], [0], [1], [0, 0, 1, 1], [], []>} : vector<16x144xbf16>, vector<144x128xbf16>, vector<16x128xf32> -> vector<16x128xf32>
    %c0_5 = arith.constant 0 : index
    %c0_6 = arith.constant 0 : index
    %10 = vector.load %arg3[%c0_5, %c0_6] : memref<1x128xf32, #tpu.memory_space<vmem>>, vector<1x128xf32>
    %11 = vector.broadcast %10 : vector<1x128xf32> to vector<16x128xf32>
    %12 = arith.addf %9, %11 : vector<16x128xf32>
    %cst_7 = arith.constant 0.000000e+00 : f32
    %13 = vector.broadcast %cst_7 : f32 to vector<16x128xf32>
    %14 = arith.maximumf %12, %13 : vector<16x128xf32>
    %c0_8 = arith.constant 0 : index
    %c0_9 = arith.constant 0 : index
    %c0_10 = arith.constant 0 : index
    %15 = vector.load %arg12[%c0_8, %c0_9, %c0_10] : memref<1x16x128xf32, #tpu.memory_space<vmem>>, vector<1x16x128xf32>
    %16 = vector.shape_cast %15 : vector<1x16x128xf32> to vector<16x128xf32>
    %17 = vector.shape_cast %14 : vector<16x128xf32> to vector<1x16x128xf32>
    tpu.vector_store %arg12[%c0_8, %c0_9, %c0_10], %17 {strides = array<i32>} : memref<1x16x128xf32, #tpu.memory_space<vmem>>, vector<1x16x128xf32>,
    %18 = arith.truncf %14 : vector<16x128xf32> to vector<16x128xbf16>
    %cst_11 = arith.constant 0.000000e+00 : bf16
    %19 = vector.broadcast %cst_11 : bf16 to vector<1x128xbf16>
    %20 = vector.extract_strided_slice %18 {offsets = [0, 0], sizes = [15, 128], strides = [1, 1]} : vector<16x128xbf16> to vector<15x128xbf16>
    %21 = tpu.concatenate %19, %20 in 0 : vector<1x128xbf16>, vector<15x128xbf16> -> vector<16x128xbf16>
    %22 = vector.extract_strided_slice %18 {offsets = [1, 0], sizes = [15, 128], strides = [1, 1]} : vector<16x128xbf16> to vector<15x128xbf16>
    %23 = tpu.concatenate %22, %19 in 0 : vector<15x128xbf16>, vector<1x128xbf16> -> vector<16x128xbf16>
    %24 = tpu.concatenate %21, %18, %23 in 1 : vector<16x128xbf16>, vector<16x128xbf16>, vector<16x128xbf16> -> vector<16x384xbf16>
    %c0_12 = arith.constant 0 : index
    %c0_13 = arith.constant 0 : index
    %25 = vector.load %arg4[%c0_12, %c0_13] : memref<384x128xbf16, #tpu.memory_space<vmem>>, vector<384x128xbf16>
    %cst_14 = arith.constant dense<0.000000e+00> : vector<16x128xf32>
    %26 = tpu.matmul %24, %25, %cst_14 {dimension_numbers = #tpu.dot_dimension_numbers<[1], [0], [0], [1], [0, 0, 1, 1], [], []>} : vector<16x384xbf16>, vector<384x128xbf16>, vector<16x128xf32> -> vector<16x128xf32>
    %c0_15 = arith.constant 0 : index
    %c0_16 = arith.constant 0 : index
    %27 = vector.load %arg5[%c0_15, %c0_16] : memref<1x128xf32, #tpu.memory_space<vmem>>, vector<1x128xf32>
    %28 = vector.broadcast %27 : vector<1x128xf32> to vector<16x128xf32>
    %29 = arith.addf %26, %28 : vector<16x128xf32>
    %cst_17 = arith.constant 0.000000e+00 : f32
    %30 = vector.broadcast %cst_17 : f32 to vector<16x128xf32>
    %31 = arith.maximumf %29, %30 : vector<16x128xf32>
    %32 = vector.extract_strided_slice %31 {offsets = [0, 8], sizes = [16, 120], strides = [1, 1]} : vector<16x128xf32> to vector<16x120xf32>
    %cst_18 = arith.constant 0.000000e+00 : f32
    %33 = vector.broadcast %cst_18 : f32 to vector<16x8xf32>
    %34 = tpu.concatenate %32, %33 in 1 : vector<16x120xf32>, vector<16x8xf32> -> vector<16x128xf32>
    %35 = arith.maximumf %31, %34 : vector<16x128xf32>
    %36 = vector.extract_strided_slice %35 {offsets = [0, 0], sizes = [1, 128], strides = [1, 1]} : vector<16x128xf32> to vector<1x128xf32>
    %37 = vector.extract_strided_slice %35 {offsets = [1, 0], sizes = [1, 128], strides = [1, 1]} : vector<16x128xf32> to vector<1x128xf32>
    %38 = arith.maximumf %36, %37 : vector<1x128xf32>
    %39 = vector.extract_strided_slice %35 {offsets = [2, 0], sizes = [1, 128], strides = [1, 1]} : vector<16x128xf32> to vector<1x128xf32>
    %40 = vector.extract_strided_slice %35 {offsets = [3, 0], sizes = [1, 128], strides = [1, 1]} : vector<16x128xf32> to vector<1x128xf32>
    %41 = arith.maximumf %39, %40 : vector<1x128xf32>
    %42 = vector.extract_strided_slice %35 {offsets = [4, 0], sizes = [1, 128], strides = [1, 1]} : vector<16x128xf32> to vector<1x128xf32>
    %43 = vector.extract_strided_slice %35 {offsets = [5, 0], sizes = [1, 128], strides = [1, 1]} : vector<16x128xf32> to vector<1x128xf32>
    %44 = arith.maximumf %42, %43 : vector<1x128xf32>
    %45 = vector.extract_strided_slice %35 {offsets = [6, 0], sizes = [1, 128], strides = [1, 1]} : vector<16x128xf32> to vector<1x128xf32>
    %46 = vector.extract_strided_slice %35 {offsets = [7, 0], sizes = [1, 128], strides = [1, 1]} : vector<16x128xf32> to vector<1x128xf32>
    %47 = arith.maximumf %45, %46 : vector<1x128xf32>
    %48 = vector.extract_strided_slice %35 {offsets = [8, 0], sizes = [1, 128], strides = [1, 1]} : vector<16x128xf32> to vector<1x128xf32>
    %49 = vector.extract_strided_slice %35 {offsets = [9, 0], sizes = [1, 128], strides = [1, 1]} : vector<16x128xf32> to vector<1x128xf32>
    %50 = arith.maximumf %48, %49 : vector<1x128xf32>
    %51 = vector.extract_strided_slice %35 {offsets = [10, 0], sizes = [1, 128], strides = [1, 1]} : vector<16x128xf32> to vector<1x128xf32>
    %52 = vector.extract_strided_slice %35 {offsets = [11, 0], sizes = [1, 128], strides = [1, 1]} : vector<16x128xf32> to vector<1x128xf32>
    %53 = arith.maximumf %51, %52 : vector<1x128xf32>
    %54 = vector.extract_strided_slice %35 {offsets = [12, 0], sizes = [1, 128], strides = [1, 1]} : vector<16x128xf32> to vector<1x128xf32>
    %55 = vector.extract_strided_slice %35 {offsets = [13, 0], sizes = [1, 128], strides = [1, 1]} : vector<16x128xf32> to vector<1x128xf32>
    %56 = arith.maximumf %54, %55 : vector<1x128xf32>
    %57 = vector.extract_strided_slice %35 {offsets = [14, 0], sizes = [1, 128], strides = [1, 1]} : vector<16x128xf32> to vector<1x128xf32>
    %58 = vector.extract_strided_slice %35 {offsets = [15, 0], sizes = [1, 128], strides = [1, 1]} : vector<16x128xf32> to vector<1x128xf32>
    %59 = arith.maximumf %57, %58 : vector<1x128xf32>
    %60 = tpu.concatenate %38, %41, %44, %47, %50, %53, %56, %59 in 0 : vector<1x128xf32>, vector<1x128xf32>, vector<1x128xf32>, vector<1x128xf32>, vector<1x128xf32>, vector<1x128xf32>, vector<1x128xf32>, vector<1x128xf32> -> vector<8x128xf32>
    %61 = arith.truncf %60 : vector<8x128xf32> to vector<8x128xbf16>
    %cst_19 = arith.constant 0.000000e+00 : bf16
    %62 = vector.broadcast %cst_19 : bf16 to vector<1x128xbf16>
    %63 = vector.extract_strided_slice %61 {offsets = [0, 0], sizes = [7, 128], strides = [1, 1]} : vector<8x128xbf16> to vector<7x128xbf16>
    %64 = tpu.concatenate %62, %63 in 0 : vector<1x128xbf16>, vector<7x128xbf16> -> vector<8x128xbf16>
    %65 = vector.extract_strided_slice %61 {offsets = [1, 0], sizes = [7, 128], strides = [1, 1]} : vector<8x128xbf16> to vector<7x128xbf16>
    %66 = tpu.concatenate %65, %62 in 0 : vector<7x128xbf16>, vector<1x128xbf16> -> vector<8x128xbf16>
    %67 = tpu.concatenate %64, %61, %66 in 1 : vector<8x128xbf16>, vector<8x128xbf16>, vector<8x128xbf16> -> vector<8x384xbf16>
    %c0_20 = arith.constant 0 : index
    %c0_21 = arith.constant 0 : index
    %68 = vector.load %arg6[%c0_20, %c0_21] : memref<384x128xbf16, #tpu.memory_space<vmem>>, vector<384x128xbf16>
    %cst_22 = arith.constant dense<0.000000e+00> : vector<8x128xf32>
    %69 = tpu.matmul %67, %68, %cst_22 {dimension_numbers = #tpu.dot_dimension_numbers<[1], [0], [0], [1], [0, 0, 1, 1], [], []>} : vector<8x384xbf16>, vector<384x128xbf16>, vector<8x128xf32> -> vector<8x128xf32>
    %c0_23 = arith.constant 0 : index
    %c0_24 = arith.constant 0 : index
    %70 = vector.load %arg7[%c0_23, %c0_24] : memref<1x128xf32, #tpu.memory_space<vmem>>, vector<1x128xf32>
    %71 = vector.broadcast %70 : vector<1x128xf32> to vector<8x128xf32>
    %72 = arith.addf %69, %71 : vector<8x128xf32>
    %cst_25 = arith.constant 0.000000e+00 : f32
    %73 = vector.broadcast %cst_25 : f32 to vector<8x128xf32>
    %74 = arith.maximumf %72, %73 : vector<8x128xf32>
    %c0_26 = arith.constant 0 : index
    %c0_27 = arith.constant 0 : index
    %c0_28 = arith.constant 0 : index
    %75 = vector.load %arg13[%c0_26, %c0_27, %c0_28] : memref<1x8x128xf32, #tpu.memory_space<vmem>>, vector<1x8x128xf32>
    %76 = vector.shape_cast %75 : vector<1x8x128xf32> to vector<8x128xf32>
    %77 = vector.shape_cast %74 : vector<8x128xf32> to vector<1x8x128xf32>
    tpu.vector_store %arg13[%c0_26, %c0_27, %c0_28], %77 {strides = array<i32>} : memref<1x8x128xf32, #tpu.memory_space<vmem>>, vector<1x8x128xf32>,
    %78 = arith.truncf %74 : vector<8x128xf32> to vector<8x128xbf16>
    %cst_29 = arith.constant 0.000000e+00 : bf16
    %79 = vector.broadcast %cst_29 : bf16 to vector<1x128xbf16>
    %80 = vector.extract_strided_slice %78 {offsets = [0, 0], sizes = [7, 128], strides = [1, 1]} : vector<8x128xbf16> to vector<7x128xbf16>
    %81 = tpu.concatenate %79, %80 in 0 : vector<1x128xbf16>, vector<7x128xbf16> -> vector<8x128xbf16>
    %82 = vector.extract_strided_slice %78 {offsets = [1, 0], sizes = [7, 128], strides = [1, 1]} : vector<8x128xbf16> to vector<7x128xbf16>
    %83 = tpu.concatenate %82, %79 in 0 : vector<7x128xbf16>, vector<1x128xbf16> -> vector<8x128xbf16>
    %84 = tpu.concatenate %81, %78, %83 in 1 : vector<8x128xbf16>, vector<8x128xbf16>, vector<8x128xbf16> -> vector<8x384xbf16>
    %c0_30 = arith.constant 0 : index
    %c0_31 = arith.constant 0 : index
    %85 = vector.load %arg8[%c0_30, %c0_31] : memref<384x128xbf16, #tpu.memory_space<vmem>>, vector<384x128xbf16>
    %cst_32 = arith.constant dense<0.000000e+00> : vector<8x128xf32>
    %86 = tpu.matmul %84, %85, %cst_32 {dimension_numbers = #tpu.dot_dimension_numbers<[1], [0], [0], [1], [0, 0, 1, 1], [], []>} : vector<8x384xbf16>, vector<384x128xbf16>, vector<8x128xf32> -> vector<8x128xf32>
    %c0_33 = arith.constant 0 : index
    %c0_34 = arith.constant 0 : index
    %87 = vector.load %arg9[%c0_33, %c0_34] : memref<1x128xf32, #tpu.memory_space<vmem>>, vector<1x128xf32>
    %88 = vector.broadcast %87 : vector<1x128xf32> to vector<8x128xf32>
    %89 = arith.addf %86, %88 : vector<8x128xf32>
    %cst_35 = arith.constant 0.000000e+00 : f32
    %90 = vector.broadcast %cst_35 : f32 to vector<8x128xf32>
    %91 = arith.maximumf %89, %90 : vector<8x128xf32>
    %92 = vector.extract_strided_slice %91 {offsets = [0, 16], sizes = [8, 112], strides = [1, 1]} : vector<8x128xf32> to vector<8x112xf32>
    %cst_36 = arith.constant 0.000000e+00 : f32
    %93 = vector.broadcast %cst_36 : f32 to vector<8x16xf32>
    %94 = tpu.concatenate %92, %93 in 1 : vector<8x112xf32>, vector<8x16xf32> -> vector<8x128xf32>
    %95 = arith.maximumf %91, %94 : vector<8x128xf32>
    %96 = vector.extract_strided_slice %95 {offsets = [0, 0], sizes = [1, 128], strides = [1, 1]} : vector<8x128xf32> to vector<1x128xf32>
    %97 = vector.extract_strided_slice %95 {offsets = [1, 0], sizes = [1, 128], strides = [1, 1]} : vector<8x128xf32> to vector<1x128xf32>
    %98 = arith.maximumf %96, %97 : vector<1x128xf32>
    %99 = vector.extract_strided_slice %95 {offsets = [2, 0], sizes = [1, 128], strides = [1, 1]} : vector<8x128xf32> to vector<1x128xf32>
    %100 = vector.extract_strided_slice %95 {offsets = [3, 0], sizes = [1, 128], strides = [1, 1]} : vector<8x128xf32> to vector<1x128xf32>
    %101 = arith.maximumf %99, %100 : vector<1x128xf32>
    %102 = vector.extract_strided_slice %95 {offsets = [4, 0], sizes = [1, 128], strides = [1, 1]} : vector<8x128xf32> to vector<1x128xf32>
    %103 = vector.extract_strided_slice %95 {offsets = [5, 0], sizes = [1, 128], strides = [1, 1]} : vector<8x128xf32> to vector<1x128xf32>
    %104 = arith.maximumf %102, %103 : vector<1x128xf32>
    %105 = vector.extract_strided_slice %95 {offsets = [6, 0], sizes = [1, 128], strides = [1, 1]} : vector<8x128xf32> to vector<1x128xf32>
    %106 = vector.extract_strided_slice %95 {offsets = [7, 0], sizes = [1, 128], strides = [1, 1]} : vector<8x128xf32> to vector<1x128xf32>
    %107 = arith.maximumf %105, %106 : vector<1x128xf32>
    %108 = tpu.concatenate %98, %101, %104, %107 in 0 : vector<1x128xf32>, vector<1x128xf32>, vector<1x128xf32>, vector<1x128xf32> -> vector<4x128xf32>
    %109 = arith.truncf %108 : vector<4x128xf32> to vector<4x128xbf16>
    %cst_37 = arith.constant 0.000000e+00 : bf16
    %110 = vector.broadcast %cst_37 : bf16 to vector<1x128xbf16>
    %111 = vector.extract_strided_slice %109 {offsets = [0, 0], sizes = [3, 128], strides = [1, 1]} : vector<4x128xbf16> to vector<3x128xbf16>
    %112 = tpu.concatenate %110, %111 in 0 : vector<1x128xbf16>, vector<3x128xbf16> -> vector<4x128xbf16>
    %113 = vector.extract_strided_slice %109 {offsets = [1, 0], sizes = [3, 128], strides = [1, 1]} : vector<4x128xbf16> to vector<3x128xbf16>
    %114 = tpu.concatenate %113, %110 in 0 : vector<3x128xbf16>, vector<1x128xbf16> -> vector<4x128xbf16>
    %115 = tpu.concatenate %112, %109, %114 in 1 : vector<4x128xbf16>, vector<4x128xbf16>, vector<4x128xbf16> -> vector<4x384xbf16>
    %c0_38 = arith.constant 0 : index
    %c0_39 = arith.constant 0 : index
    %116 = vector.load %arg10[%c0_38, %c0_39] : memref<384x128xbf16, #tpu.memory_space<vmem>>, vector<384x128xbf16>
    %cst_40 = arith.constant dense<0.000000e+00> : vector<4x128xf32>
    %117 = tpu.matmul %115, %116, %cst_40 {dimension_numbers = #tpu.dot_dimension_numbers<[1], [0], [0], [1], [0, 0, 1, 1], [], []>} : vector<4x384xbf16>, vector<384x128xbf16>, vector<4x128xf32> -> vector<4x128xf32>
    %c0_41 = arith.constant 0 : index
    %c0_42 = arith.constant 0 : index
    %118 = vector.load %arg11[%c0_41, %c0_42] : memref<1x128xf32, #tpu.memory_space<vmem>>, vector<1x128xf32>
    %119 = vector.broadcast %118 : vector<1x128xf32> to vector<4x128xf32>
    %120 = arith.addf %117, %119 : vector<4x128xf32>
    %cst_43 = arith.constant 0.000000e+00 : f32
    %121 = vector.broadcast %cst_43 : f32 to vector<4x128xf32>
    %122 = arith.maximumf %120, %121 : vector<4x128xf32>
    %c0_44 = arith.constant 0 : index
    %c0_45 = arith.constant 0 : index
    %c0_46 = arith.constant 0 : index
    %123 = vector.load %arg14[%c0_44, %c0_45, %c0_46] : memref<1x4x128xf32, #tpu.memory_space<vmem>>, vector<1x4x128xf32>
    %124 = vector.shape_cast %123 : vector<1x4x128xf32> to vector<4x128xf32>
    %125 = vector.shape_cast %122 : vector<4x128xf32> to vector<1x4x128xf32>
    tpu.vector_store %arg14[%c0_44, %c0_45, %c0_46], %125 {strides = array<i32>} : memref<1x4x128xf32, #tpu.memory_space<vmem>>, vector<1x4x128xf32>,
    return
  }
  func.func @transform_0(%arg0: i32) -> (i32, i32, i32) {
    %c0_i32 = arith.constant 0 : i32
    %c0_i32_0 = arith.constant 0 : i32
    %c0_i32_1 = arith.constant 0 : i32
    return %arg0, %c0_i32, %c0_i32_0 : i32, i32, i32
  }
  func.func @transform_1(%arg0: i32) -> (i32, i32) {
    %c0_i32 = arith.constant 0 : i32
    %c0_i32_0 = arith.constant 0 : i32
    %c0_i32_1 = arith.constant 0 : i32
    return %c0_i32, %c0_i32_0 : i32, i32
  }
  func.func @transform_2(%arg0: i32) -> (i32, i32) {
    %c0_i32 = arith.constant 0 : i32
    %c0_i32_0 = arith.constant 0 : i32
    %c0_i32_1 = arith.constant 0 : i32
    return %c0_i32, %c0_i32_0 : i32, i32
  }
  func.func @transform_3(%arg0: i32) -> (i32, i32) {
    %c0_i32 = arith.constant 0 : i32
    %c0_i32_0 = arith.constant 0 : i32
    %c0_i32_1 = arith.constant 0 : i32
    return %c0_i32, %c0_i32_0 : i32, i32
  }
  func.func @transform_4(%arg0: i32) -> (i32, i32) {
    %c0_i32 = arith.constant 0 : i32
    %c0_i32_0 = arith.constant 0 : i32
    %c0_i32_1 = arith.constant 0 : i32
    return %c0_i32, %c0_i32_0 : i32, i32
  }
  func.func @transform_5(%arg0: i32) -> (i32, i32) {
    %c0_i32 = arith.constant 0 : i32
    %c0_i32_0 = arith.constant 0 : i32
    %c0_i32_1 = arith.constant 0 : i32
    return %c0_i32, %c0_i32_0 : i32, i32
  }
  func.func @transform_6(%arg0: i32) -> (i32, i32) {
    %c0_i32 = arith.constant 0 : i32
    %c0_i32_0 = arith.constant 0 : i32
    %c0_i32_1 = arith.constant 0 : i32
    return %c0_i32, %c0_i32_0 : i32, i32
  }
  func.func @transform_7(%arg0: i32) -> (i32, i32) {
    %c0_i32 = arith.constant 0 : i32
    %c0_i32_0 = arith.constant 0 : i32
    %c0_i32_1 = arith.constant 0 : i32
    return %c0_i32, %c0_i32_0 : i32, i32
  }
  func.func @transform_8(%arg0: i32) -> (i32, i32) {
    %c0_i32 = arith.constant 0 : i32
    %c0_i32_0 = arith.constant 0 : i32
    %c0_i32_1 = arith.constant 0 : i32
    return %c0_i32, %c0_i32_0 : i32, i32
  }
  func.func @transform_9(%arg0: i32) -> (i32, i32) {
    %c0_i32 = arith.constant 0 : i32
    %c0_i32_0 = arith.constant 0 : i32
    %c0_i32_1 = arith.constant 0 : i32
    return %c0_i32, %c0_i32_0 : i32, i32
  }
  func.func @transform_10(%arg0: i32) -> (i32, i32) {
    %c0_i32 = arith.constant 0 : i32
    %c0_i32_0 = arith.constant 0 : i32
    %c0_i32_1 = arith.constant 0 : i32
    return %c0_i32, %c0_i32_0 : i32, i32
  }
  func.func @transform_11(%arg0: i32) -> (i32, i32, i32) {
    %c0_i32 = arith.constant 0 : i32
    %c0_i32_0 = arith.constant 0 : i32
    %c0_i32_1 = arith.constant 0 : i32
    return %arg0, %c0_i32, %c0_i32_0 : i32, i32, i32
  }
  func.func @transform_12(%arg0: i32) -> (i32, i32, i32) {
    %c0_i32 = arith.constant 0 : i32
    %c0_i32_0 = arith.constant 0 : i32
    %c0_i32_1 = arith.constant 0 : i32
    return %arg0, %c0_i32, %c0_i32_0 : i32, i32, i32
  }
  func.func @transform_13(%arg0: i32) -> (i32, i32, i32) {
    %c0_i32 = arith.constant 0 : i32
    %c0_i32_0 = arith.constant 0 : i32
    %c0_i32_1 = arith.constant 0 : i32
    return %arg0, %c0_i32, %c0_i32_0 : i32, i32, i32
  }
}

</mosaic_0001>

<bundles_post_ra>
// kernel: _forward_impl.1
= control target key start
LH: loop header
LB: loop body
LE: loop exit
PB: predicated region body
PF: predicated region fallthrough
CT: control target
= control target key end

     0   :  { %19 = vsyncpa [#allocation3], 0  ;;  %s2925_s0 = inlined_call_operand.vmem [shape: bf16[2,16,48], index: 0, kind: input, shape index: {}]   ;;  %s2926_s1 = inlined_call_operand.vmem [shape: bf16[144,128], index: 1, kind: input, shape index: {}]   ;;  %s2927_s2 = inlined_call_operand.vmem [shape: f32[1,128], index: 2, kind: input, shape index: {}]   ;;  %s2928_s3 = inlined_call_operand.vmem [shape: bf16[384,128], index: 3, kind: input, shape index: {}]   ;;  %s2929_s4 = inlined_call_operand.vmem [shape: f32[1,128], index: 4, kind: input, shape index: {}]   ;;  %s2930_s5 = inlined_call_operand.hbm [shape: bf16[384,128], index: 5, kind: input, shape index: {}]   ;;  %s2931_s6 = inlined_call_operand.vmem [shape: f32[1,128], index: 6, kind: input, shape index: {}]   ;;  %s2932_s7 = inlined_call_operand.hbm [shape: bf16[384,128], index: 7, kind: input, shape index: {}]   ;;  %s2933_s8 = inlined_call_operand.vmem [shape: f32[1,128], index: 8, kind: input, shape index: {}]   ;;  %s2934_s9 = inlined_call_operand.hbm [shape: bf16[384,128], index: 9, kind: input, shape index: {}]   ;;  %s2935_s10 = inlined_call_operand.vmem [shape: f32[1,128], index: 10, kind: input, shape index: {}]   ;;  %s2936_s11 = inlined_call_operand.vmem [shape: f32[2,16,128], index: 11, kind: output, shape index: {0}]   ;;  %s2937_s12 = inlined_call_operand.vmem [shape: f32[2,8,128], index: 12, kind: output, shape index: {1}]   ;;  %s2938_s13 = inlined_call_operand.vmem [shape: f32[2,4,128], index: 13, kind: output, shape index: {2}]  }
   0x1   :  { %20 = vsyncpa [#allocation5], 0  ;;  %s2698_s25 = smov 0  }
   0x2 LB: > { %s2704_s26 = sadd.s32 4294967295, %s2617_s25   ;;  %p1913_p0 = scmp.ge.s32.totalorder %s2617_s25, 1  ;;  %s2617_s25 = sphi %s2698_s25, %s26_s25  }
   0x3   : > { %p345_p1 = scmp.lt.s32.totalorder %s2617_s25, 3  ;;  %p2485_p2 = scmp.eq.s32.totalorder %s2704_s26, 0 }
   0x4   : > { %s385_s29 = sshll.u32 %s2932_s7, 4  ;;  %s368_s16 = sshll.u32 %s2930_s5, 4  ;;  %s386_s29 = int_to_ptr.hbm [resolvable:$true] %s385_s29  ;;  %s369_s16 = int_to_ptr.hbm [resolvable:$true] %s368_s16 }
   0x5   : > { %p2712_p3 = pnand %p1913_p0, %p345_p1  ;;  %s2619_s17 = smov [#allocation4]  }
   0x6   : > { %s387_s18 = sshll.u32 %s2619_s17, 4  ;;  %s2620_s19 = smov [#allocation2]   ;;  %s388_s18 = int_to_ptr.vmem [resolvable:$true] %s387_s18 }
   0x7   : > { %p2475_p4 = pneg %p2712_p3  ;;  %s370_s20 = sshll.u32 %s2620_s19, 4  ;;  %s371_s20 = int_to_ptr.vmem [resolvable:$true] %s370_s20 }
   0x8   : > { %s402_s23 = sshll.u32 %s2934_s9, 4  ;;  %s2621_s24 = smov 64   ;;  %s403_s23 = int_to_ptr.hbm [resolvable:$true] %s402_s23 }
   0x9   : > { %p2476_p5 = pnand %p2485_p2, %p2475_p4  ;;  %s2622_s27 = smov 4  }
   0xa   : > { %s2623_s28 = smov [#allocation6]   ;;  %431 = sbr.rel (%p2712_p3) target bundleno = 1132 (0x46c), region = 64 }
   0xb   : > { %2481 = dma.hbm_to_vmem [thread:$0]  (!%p2476_p5), %s386_s29, 3072, %s388_s18, [#allocation5], %s2621_s24, %s2621_s24, %s2622_s27  }
   0xc   : > { %2478 = dma.hbm_to_vmem [thread:$0]  (!%p2476_p5), %s369_s16, 3072, %s371_s20, [#allocation3], %s2621_s24, %s2621_s24, %s2622_s27  }
   0xd   : > { %s404_s14 = sshll.u32 %s2623_s28, 4  ;;  %s405_s14 = int_to_ptr.vmem [resolvable:$true] %s404_s14 }
   0xe   : > { %2484 = dma.hbm_to_vmem [thread:$0]  (!%p2476_p5), %s403_s23, 3072, %s405_s14, [#allocation5], %s2621_s24, %s2621_s24, %s2622_s27  }
   0xf   : > { %2608 = dma.done.wait (%p2485_p2), [#allocation3], 3072  }
  0x10   : > { %2610 = vsyncadd (%p2485_p2), [#allocation3], 4294964224 }
  0x11   : > { %2612 = dma.done.wait (%p2485_p2), [#allocation5], 6144  }
  0x12   : > { %2614 = vsyncadd (%p2485_p2), [#allocation5], 4294961152  ;;  %p494_p6 = scmp.lt.s32.totalorder %s2704_s26, 1  ;;  %v2365_v1 = vld [vmem:[%s2926_s1 + $0x38] sm:$0xff]  ;;  %vm536_vm0 = vsmask.f32 7424 }
  0x13   : > { %s2624_s19 = smov 48   ;;  %vm535_vm1 = vcmask 1047552   ;;  %631 = vmatpush.bf16.msra.mxu0 %v2365_v1  ;;  %v2364_v4 = vld [vmem:[%s2926_s1 + $0x30] sm:$0xff]  ;;  %v2363_v8 = vld [vmem:[%s2926_s1 + $0x28] sm:$0xff]  ;;  %s2625_s24 = smov 96   ;;  %v2362_v10 = vld [vmem:[%s2926_s1 + $0x20] sm:$0xff] }
  0x14   : > { %s2947_s26 = smov (!%p494_p6, %s2704_s26), 1  ;;  %vm2752_vm2 = vmand %vm535_vm1, %vm536_vm0  ;;  %v2361_v11 = vld [vmem:[%s2926_s1 + $0x18] sm:$0xff]  ;;  %v2360_v12 = vld [vmem:[%s2926_s1 + $0x10] sm:$0xff]  ;;  %vm528_vm3 = vcmask 1040384   ;;  %vm529_vm4 = vsmask.f32 256 }
  0x15   : > { %s2355_s29 = sshll.u32 %s2947_s26, 3  ;;  %v2359_v13 = vld [vmem:[%s2926_s1 + $0x8] sm:$0xff]  ;;  %v2366_v14 = vld [vmem:[%s2926_s1 + $0x40] sm:$0xff]  ;;  %v2382_v16 = vld [vmem:[%s2928_s3 + $0x78] sm:$0xff]  ;;  %vm544_vm6 = vcmask 392192   ;;  %vm628_vm7 = vcmask 130048  }
  0x16   : > { %s498_s16 = scalar_lea.vmem %s2925_s0, %s2355_s29  ;;  %652 = vmatpush.bf16.msra.mxu1 %v2366_v14  ;;  %v2358_v15 = vld [vmem:[%s2926_s1] sm:$0xff]  ;;  %v2374_v17 = vld [vmem:[%s2928_s3 + $0x38] sm:$0xff]  ;;  %894 = vmatpush.bf16.msra.mxu3 %v2382_v16  ;;  %v2381_v19 = vld [vmem:[%s2928_s3 + $0x70] sm:$0xff]  ;;  %vm548_vm8 = vcmask 785408   ;;  %s2356_s17 = sshll.u32 %s2947_s26, 4  ;;  %vm932_vm9 = vcmask 982016  }
  0x17   : > { %v2357_v0 = vld [vmem:[%s498_s16] sm:$0xff]  ;;  %632 = vmatpush.bf16.msra.mxu0 %v2364_v4  ;;  %v2390_v18 = vld [vmem:[%s2928_s3 + $0xb8] sm:$0xff]  ;;  %880 = vmatpush.bf16.msra.mxu2 %v2374_v17  ;;  %v2380_v20 = vld [vmem:[%s2928_s3 + $0x68] sm:$0xff]  ;;  %s503_s20 = scalar_lea.vmem %s2936_s11, %s2356_s17  ;;  %s2626_s23 = smov 120   ;;  %vm963_vm10 = vcmask 1041408   ;;  %vm965_vm11 = vcmask 1042432  }
  0x18   : > { %539 = vrot.lane.b32.xlu0 %v2357_v0, %s2624_s19  ;;  %v521_v2 = vshrl.u32 %v2357_v0, 16  ;;  %v524_v3 = vshll.u32 %v2357_v0, 16  ;;  %vm2795_vm5 = vmand %vm528_vm3, %vm529_vm4  ;;  %v2373_v29 = vld [vmem:[%s2928_s3 + $0x30] sm:$0xff]  ;;  %v2379_v31 = vld [vmem:[%s2928_s3 + $0x60] sm:$0xff]  ;;  %vm967_vm12 = vcmask 1043456   ;;  %vm969_vm13 = vcmask 1044480   ;;  %s507_s30 = scalar_lea.vmem %s2937_s12, %s2355_s29 }
  0x19   : > { %v2389_v30 = vld [vmem:[%s2928_s3 + $0xb0] sm:$0xff]  ;;  %v2372_v32 = vld [vmem:[%s2928_s3 + $0x28] sm:$0xff]  ;;  %v2378_v34 = vld [vmem:[%s2928_s3 + $0x58] sm:$0xff]  ;;  %vm971_vm14 = vcmask 1045504   ;;  %vm973_vm15 = vcmask 1046528   ;;  %s2627_s16 = smov 112  }
  0x1a   : > { %v532_v5 = vrot.slane %v524_v3, 1  ;;  %908 = vmatpush.bf16.msrb.mxu1 %v2390_v18  ;;  %895 = vmatpush.bf16.msra.mxu3 %v2381_v19  ;;  %v523_v21 = vrot.slane %v521_v2, 7  ;;  %v2388_v33 = vld [vmem:[%s2928_s3 + $0xa8] sm:$0xff]  ;;  %v2371_v35 = vld [vmem:[%s2928_s3 + $0x20] sm:$0xff]  ;;  %v2377_v37 = vld [vmem:[%s2928_s3 + $0x50] sm:$0xff]  ;;  %s1927_s19 = sshll.u32 %s2947_s26, 2 }
  0x1b   : > { %633 = vmatpush.bf16.msra.mxu0 %v2363_v8  ;;  %881 = vmatpush.bf16.msra.mxu2 %v2373_v29  ;;  %v2387_v36 = vld [vmem:[%s2928_s3 + $0xa0] sm:$0xff]  ;;  %v2370_v38 = vld [vmem:[%s2928_s3 + $0x18] sm:$0xff]  ;;  %v2376_v40 = vld [vmem:[%s2928_s3 + $0x48] sm:$0xff]  ;;  %vm992_vm0 = vsmask.f32 3328  ;;  %s511_s22 = scalar_lea.vmem %s2938_s13, %s1927_s19 }
  0x1c   : > { %v533_v7 = vor.u32 %v532_v5, %v521_v2  ;;  %v526_v23 = vor.u32 %v524_v3, %v523_v21  ;;  %v2386_v39 = vld [vmem:[%s2928_s3 + $0x98] sm:$0xff]  ;;  %v2369_v41 = vld [vmem:[%s2928_s3 + $0x10] sm:$0xff]  ;;  %v2375_v43 = vld [vmem:[%s2928_s3 + $0x40] sm:$0xff]  ;;  %vm1523_vm4 = vsmask.f32 1280 }
  0x1d   : > { %v2385_v42 = vld [vmem:[%s2928_s3 + $0x90] sm:$0xff]  ;;  %v2368_v44 = vld [vmem:[%s2928_s3 + $0x8] sm:$0xff]  ;;  %v2367_v46 = vld [vmem:[%s2928_s3] sm:$0xff] }
  0x1e   : > { %v538_v9 = vsel %vm2752_vm2, %v533_v7, 0  ;;  %896 = vmatpush.bf16.msra.mxu3 %v2380_v20  ;;  %v531_v25 = vsel %vm2795_vm5, 0, %v526_v23  ;;  %909 = vmatpush.bf16.msrb.mxu1 %v2389_v30  ;;  %v2384_v45 = vld [vmem:[%s2928_s3 + $0x88] sm:$0xff]  ;;  %v2383_v47 = vld [vmem:[%s2928_s3 + $0x80] sm:$0xff]  ;;  %v2397_v30 = vld [vmem:[#allocation2 + $0x30] sm:$0xff] }
  0x1f   : > { %634 = vmatpush.bf16.msra.mxu0 %v2362_v10  ;;  %882 = vmatpush.bf16.msra.mxu2 %v2372_v32  ;;  %v2508_v48 = vld [vmem:[%s2927_s2] ss:$0 sm:$0xff]  ;;  %v2405_v10 = vld [vmem:[#allocation2 + $0x70] sm:$0xff]  ;;  %v2402_v32 = vld [vmem:[#allocation2 + $0x58] sm:$0xff] }
  0x20   : > { %542 = vrot.lane.b32.xlu0 %v538_v9, %s2625_s24  ;;  %v2406_v9 = vld [vmem:[#allocation2 + $0x78] sm:$0xff]  ;;  %v2403_v29 = vld [vmem:[#allocation2 + $0x60] sm:$0xff]  ;;  %vm2886_vm1 = vmand %vm967_vm12, %vm992_vm0 }
  0x22   : > { %897 = vmatpush.bf16.msra.mxu3 %v2379_v31  ;;  %910 = vmatpush.bf16.msrb.mxu1 %v2388_v33  ;;  %v2413_v31 = vld [vmem:[#allocation2 + $0xb0] sm:$0xff]  ;;  %v2396_v33 = vld [vmem:[#allocation2 + $0x28] sm:$0xff] }
  0x23   : > { %635 = vmatpush.bf16.msra.mxu0 %v2361_v11  ;;  %883 = vmatpush.bf16.msra.mxu2 %v2371_v35  ;;  %v2509_v11 = vld [vmem:[%s2929_s4] ss:$0 sm:$0xff]  ;;  %v2401_v35 = vld [vmem:[#allocation2 + $0x50] sm:$0xff] }
  0x26   : > { %898 = vmatpush.bf16.msra.mxu3 %v2378_v34  ;;  %911 = vmatpush.bf16.msrb.mxu1 %v2387_v36  ;;  %v2412_v34 = vld [vmem:[#allocation2 + $0xa8] sm:$0xff]  ;;  %v2395_v36 = vld [vmem:[#allocation2 + $0x20] sm:$0xff] }
  0x27   : > { %636 = vmatpush.bf16.msra.mxu0 %v2360_v12  ;;  %884 = vmatpush.bf16.msra.mxu2 %v2370_v38  ;;  %v2400_v38 = vld [vmem:[#allocation2 + $0x48] sm:$0xff] }
  0x2a   : > { %899 = vmatpush.bf16.msra.mxu3 %v2377_v37  ;;  %912 = vmatpush.bf16.msrb.mxu1 %v2386_v39  ;;  %v2411_v37 = vld [vmem:[#allocation2 + $0xa0] sm:$0xff]  ;;  %v2394_v39 = vld [vmem:[#allocation2 + $0x18] sm:$0xff] }
  0x2b   : > { %637 = vmatpush.bf16.msra.mxu0 %v2359_v13  ;;  %885 = vmatpush.bf16.msra.mxu2 %v2369_v41  ;;  %v2399_v41 = vld [vmem:[#allocation2 + $0x40] sm:$0xff] }
  0x2e   : > { %900 = vmatpush.bf16.msra.mxu3 %v2376_v40  ;;  %913 = vmatpush.bf16.msrb.mxu1 %v2385_v42  ;;  %v2410_v40 = vld [vmem:[#allocation2 + $0x98] sm:$0xff]  ;;  %v2393_v42 = vld [vmem:[#allocation2 + $0x10] sm:$0xff] }
  0x2f   : > { %638 = vmatpush.bf16.msra.mxu0 %v2358_v15  ;;  %886 = vmatpush.bf16.msra.mxu2 %v2368_v44  ;;  %v2392_v44 = vld [vmem:[#allocation2 + $0x8] sm:$0xff] }
  0x32   : > { %901 = vmatpush.bf16.msra.mxu3 %v2375_v43  ;;  %914 = vmatpush.bf16.msrb.mxu1 %v2384_v45  ;;  %v2409_v43 = vld [vmem:[#allocation2 + $0x90] sm:$0xff]  ;;  %v2408_v45 = vld [vmem:[#allocation2 + $0x88] sm:$0xff] }
  0x33   : > { %887 = vmatpush.bf16.msra.mxu2 %v2367_v46  ;;  %v2391_v46 = vld [vmem:[#allocation2] sm:$0xff] }
  0x36   : > { %915 = vmatpush.bf16.msrb.mxu1 %v2383_v47  ;;  %v2407_v47 = vld [vmem:[#allocation2 + $0x80] sm:$0xff] }
  0x37   : > { %1204 = vmatpush.bf16.msrb.mxu2 %v2406_v9 }
  0x3b   : > { %1205 = vmatpush.bf16.msrb.mxu2 %v2405_v10 }
  0x8a   : > { %v540_v22 = vpop.permute.xlu0 %539 }
  0x8b   : > { %v547_v26 = vsel %vm544_vm6, %v531_v25, %v540_v22  ;;  %vm1524_vm6 = vmand %vm963_vm10, %vm1523_vm4 }
  0x92   : > { %v543_v27 = vpop.permute.xlu0 %542 }
  0x93   : > { %1968 = vmatmul.msk.bf16.vlgmr.msra.gmra.mxu1 %vm628_vm7, %v543_v27  ;;  %v550_v28 = vsel %vm548_vm8, %v547_v26, %v543_v27  ;;  %v2404_v26 = vld [vmem:[#allocation2 + $0x68] sm:$0xff]  ;;  %v2398_v27 = vld [vmem:[#allocation2 + $0x38] sm:$0xff] }
  0x94   : > { %639 = vmatmul.bf16.vlgmr.msra.gmra.mxu0 %v550_v28  ;;  %1206 = vmatpush.bf16.msrb.mxu2 %v2404_v26  ;;  %v2414_v28 = vld [vmem:[#allocation2 + $0xb8] sm:$0xff] }
  0x95   : > { %1191 = vmatpush.bf16.msrb.mxu0 %v2398_v27  ;;  %1217 = vmatpush.bf16.msrb.mxu3 %v2414_v28  ;;  %v2421_v27 = vld [vmem:[#allocation4 + $0x30] sm:$0xff] }
  0x96   : > { %v2437_v28 = vld [vmem:[#allocation4 + $0xb0] sm:$0xff] }
  0x98   : > { %1207 = vmatpush.bf16.msrb.mxu2 %v2403_v29  ;;  %v2426_v29 = vld [vmem:[#allocation4 + $0x58] sm:$0xff] }
  0x99   : > { %1192 = vmatpush.bf16.msrb.mxu0 %v2397_v30  ;;  %1218 = vmatpush.bf16.msrb.mxu3 %v2413_v31  ;;  %v2420_v30 = vld [vmem:[#allocation4 + $0x28] sm:$0xff] }
  0x9a   : > { %v2436_v31 = vld [vmem:[#allocation4 + $0xa8] sm:$0xff] }
  0x9c   : > { %1208 = vmatpush.bf16.msrb.mxu2 %v2402_v32  ;;  %v2425_v32 = vld [vmem:[#allocation4 + $0x50] sm:$0xff] }
  0x9d   : > { %1193 = vmatpush.bf16.msrb.mxu0 %v2396_v33  ;;  %1219 = vmatpush.bf16.msrb.mxu3 %v2412_v34  ;;  %v2419_v33 = vld [vmem:[#allocation4 + $0x20] sm:$0xff] }
  0x9e   : > { %v2435_v34 = vld [vmem:[#allocation4 + $0xa0] sm:$0xff] }
  0xa0   : > { %1209 = vmatpush.bf16.msrb.mxu2 %v2401_v35  ;;  %v2424_v35 = vld [vmem:[#allocation4 + $0x48] sm:$0xff] }
  0xa1   : > { %1194 = vmatpush.bf16.msrb.mxu0 %v2395_v36  ;;  %1220 = vmatpush.bf16.msrb.mxu3 %v2411_v37  ;;  %v2418_v36 = vld [vmem:[#allocation4 + $0x18] sm:$0xff] }
  0xa2   : > { %v2434_v37 = vld [vmem:[#allocation4 + $0x98] sm:$0xff] }
  0xa4   : > { %1210 = vmatpush.bf16.msrb.mxu2 %v2400_v38  ;;  %v2423_v38 = vld [vmem:[#allocation4 + $0x40] sm:$0xff] }
  0xa5   : > { %1195 = vmatpush.bf16.msrb.mxu0 %v2394_v39  ;;  %1221 = vmatpush.bf16.msrb.mxu3 %v2410_v40  ;;  %v2417_v39 = vld [vmem:[#allocation4 + $0x10] sm:$0xff] }
  0xa6   : > { %v2433_v40 = vld [vmem:[#allocation4 + $0x90] sm:$0xff] }
  0xa8   : > { %1211 = vmatpush.bf16.msrb.mxu2 %v2399_v41  ;;  %v2416_v41 = vld [vmem:[#allocation4 + $0x8] sm:$0xff] }
  0xa9   : > { %1196 = vmatpush.bf16.msrb.mxu0 %v2393_v42  ;;  %1222 = vmatpush.bf16.msrb.mxu3 %v2409_v43  ;;  %v2432_v42 = vld [vmem:[#allocation4 + $0x88] sm:$0xff]  ;;  %v2415_v43 = vld [vmem:[#allocation4] sm:$0xff] }
  0xad   : > { %1197 = vmatpush.bf16.msrb.mxu0 %v2392_v44  ;;  %1223 = vmatpush.bf16.msrb.mxu3 %v2408_v45  ;;  %v2431_v44 = vld [vmem:[#allocation4 + $0x80] sm:$0xff] }
  0xb1   : > { %1198 = vmatpush.bf16.msrb.mxu0 %v2391_v46  ;;  %1224 = vmatpush.bf16.msrb.mxu3 %v2407_v47  ;;  %v2510_v46 = vld [vmem:[%s2931_s6] ss:$0 sm:$0xff] }
 0x110   : > { %v654_v49 = vpop.f32.mrf.mxu1 }
 0x111   : > { %v640_v50 = vpop.f32.mrf.mxu0 }
 0x112   : > { %v641_v51 = vadd.f32 %v2508_v48, %v640_v50 }
 0x114   : > { %v655_v52 = vadd.f32 %v654_v49, %v641_v51  ;;  %v2430_v51 = vld [vmem:[#allocation4 + $0x78] sm:$0xff] }
 0x115   : > { %1458 = vmatpush.bf16.msra.mxu0 %v2430_v51 }
 0x116   : > { %v659_v53 = vmax.f32 %v655_v52, 0.0 }
 0x118   : > { %661 = vst [vmem:[%s503_s20] sm:$0xff] %v659_v53  ;;  %v656_v56 = vpop.f32.mrf.mxu1  ;;  %v663_v58 = vpack.c.bf16 %v659_v53, %v659_v53  ;;  %v2422_v53 = vld [vmem:[#allocation4 + $0x38] sm:$0xff] }
 0x119   : > { %v642_v54 = vpop.f32.mrf.mxu0  ;;  %1445 = vmatpush.bf16.msra.mxu1 %v2422_v53 }
 0x11a   : > { %v643_v55 = vadd.f32 %v2508_v48, %v642_v54  ;;  %v667_v61 = vunpack.c.l.b16 %v663_v58  ;;  %v2438_v54 = vld [vmem:[#allocation4 + $0xb8] sm:$0xff] }
 0x11c   : > { %v657_v57 = vadd.f32 %v656_v56, %v643_v55  ;;  %v2429_v55 = vld [vmem:[#allocation4 + $0x70] sm:$0xff] }
 0x11d   : > { %1459 = vmatpush.bf16.msra.mxu0 %v2429_v55  ;;  %1446 = vmatpush.bf16.msra.mxu1 %v2421_v27  ;;  %v2443_v27 = vld [vmem:[#allocation6 + $0x20] sm:$0xff] }
 0x11e   : > { %v660_v59 = vmax.f32 %v657_v57, 0.0 }
 0x120   : > { %662 = vst [vmem:[%s503_s20 + $0x8] sm:$0xff] %v660_v59  ;;  %v664_v60 = vpack.c.bf16 %v660_v59, %v660_v59 }
 0x121   : > { %1447 = vmatpush.bf16.msra.mxu1 %v2420_v30  ;;  %v2442_v30 = vld [vmem:[#allocation6 + $0x18] sm:$0xff] }
 0x122   : > { %v668_v62 = vunpack.c.l.b16 %v664_v60  ;;  %v2428_v60 = vld [vmem:[#allocation4 + $0x68] sm:$0xff] }
 0x123   : > { %1460 = vmatpush.bf16.msra.mxu0 %v2428_v60 }
 0x124   : > { %v669_v63 = vpack.c.b16 %v668_v62, %v667_v61 }
 0x125   : > { %1448 = vmatpush.bf16.msra.mxu1 %v2419_v33  ;;  %v2441_v33 = vld [vmem:[#allocation6 + $0x10] sm:$0xff] }
 0x126   : > { %902 = vmatmul.bf16.vlgmr.msra.gmra.mxu3 %v669_v63  ;;  %v671_v0 = vshrl.u32 %v669_v63, 16  ;;  %v674_v1 = vshll.u32 %v669_v63, 16 }
 0x128   : > { %v673_v2 = vrot.slane %v671_v0, 7  ;;  %v679_v3 = vrot.slane %v674_v1, 1 }
 0x129   : > { %1449 = vmatpush.bf16.msra.mxu1 %v2418_v36  ;;  %v2456_v36 = vld [vmem:[#allocation6 + $0x88] sm:$0xff] }
 0x12a   : > { %v676_v4 = vor.u32 %v674_v1, %v673_v2  ;;  %v680_v5 = vor.u32 %v679_v3, %v671_v0  ;;  %v2427_v1 = vld [vmem:[#allocation4 + $0x60] sm:$0xff] }
 0x12b   : > { %1461 = vmatpush.bf16.msra.mxu0 %v2427_v1 }
 0x12c   : > { %v678_v7 = vsel %vm2795_vm5, 0, %v676_v4  ;;  %v682_v8 = vsel %vm2752_vm2, %v680_v5, 0  ;;  %vm1489_vm2 = vcmask 916480  }
 0x12d   : > { %888 = vmatmul.bf16.vlgmr.msra.gmra.mxu2 %v678_v7  ;;  %916 = vmatmul.bf16.vlgmr.msrb.gmra.mxu1 %v682_v8 }
 0x12e   : > { %1471 = vmatpush.bf16.msra.mxu2 %v2438_v54  ;;  %1450 = vmatpush.bf16.msra.mxu1 %v2417_v39 }
 0x12f   : > { %1462 = vmatpush.bf16.msra.mxu0 %v2426_v29  ;;  %v2448_v29 = vld [vmem:[#allocation6 + $0x48] sm:$0xff] }
 0x132   : > { %1472 = vmatpush.bf16.msra.mxu2 %v2437_v28  ;;  %1451 = vmatpush.bf16.msra.mxu1 %v2416_v41  ;;  %v2459_v28 = vld [vmem:[#allocation6 + $0xa0] sm:$0xff] }
 0x133   : > { %1463 = vmatpush.bf16.msra.mxu0 %v2425_v32  ;;  %v2447_v32 = vld [vmem:[#allocation6 + $0x40] sm:$0xff] }
 0x136   : > { %1473 = vmatpush.bf16.msra.mxu2 %v2436_v31  ;;  %1452 = vmatpush.bf16.msra.mxu1 %v2415_v43  ;;  %v2458_v31 = vld [vmem:[#allocation6 + $0x98] sm:$0xff] }
 0x137   : > { %1464 = vmatpush.bf16.msra.mxu0 %v2424_v35  ;;  %v2440_v35 = vld [vmem:[#allocation6 + $0x8] sm:$0xff] }
 0x13a   : > { %1474 = vmatpush.bf16.msra.mxu2 %v2435_v34  ;;  %v2457_v34 = vld [vmem:[#allocation6 + $0x90] sm:$0xff] }
 0x13b   : > { %1465 = vmatpush.bf16.msra.mxu0 %v2423_v38  ;;  %v2455_v38 = vld [vmem:[#allocation6 + $0x80] sm:$0xff] }
 0x13e   : > { %1475 = vmatpush.bf16.msra.mxu2 %v2434_v37  ;;  %v2439_v37 = vld [vmem:[#allocation6] sm:$0xff] }
 0x142   : > { %1476 = vmatpush.bf16.msra.mxu2 %v2433_v40 }
 0x146   : > { %1477 = vmatpush.bf16.msra.mxu2 %v2432_v42 }
 0x14a   : > { %1478 = vmatpush.bf16.msra.mxu2 %v2431_v44 }
 0x1a9   : > { %v903_v12 = vpop.f32.mrf.mxu3 }
 0x1aa   : > { %v917_v15 = vpop.f32.mrf.mxu1 }
 0x1b0   : > { %v889_v13 = vpop.f32.mrf.mxu2 }
 0x1b1   : > { %v890_v14 = vadd.f32 %v2509_v11, %v889_v13  ;;  %v905_v20 = vpop.f32.mrf.mxu3 }
 0x1b2   : > { %v919_v22 = vpop.f32.mrf.mxu1 }
 0x1b3   : > { %v904_v16 = vadd.f32 %v903_v12, %v890_v14 }
 0x1b5   : > { %v918_v17 = vadd.f32 %v917_v15, %v904_v16 }
 0x1b7   : > { %v922_v18 = vmax.f32 %v918_v17, 0.0 }
 0x1b8   : > { %v891_v19 = vpop.f32.mrf.mxu2 }
 0x1b9   : > { %v892_v6 = vadd.f32 %v2509_v11, %v891_v19  ;;  %926 = vrot.lane.b32.xlu1 %v922_v18, %s2626_s23 }
 0x1bb   : > { %v906_v21 = vadd.f32 %v905_v20, %v892_v6 }
 0x1bd   : > { %v2872_v23 = vadd.f32 %v919_v22, %v906_v21 }
 0x1bf   : > { %v923_v25 = vmax.f32 %v2872_v23, 0.0 }
 0x1c1   : > { %928 = vrot.lane.b32.xlu1 %v923_v25, %s2626_s23 }
 0x22b   : > { %v927_v48 = vpop.permute.xlu1 %926 }
 0x22c   : > { %v933_v49 = vsel %vm932_vm9, %v927_v48, 0.0 }
 0x22d   : > { %v935_v50 = vmax.f32 %v922_v18, %v933_v49 }
 0x22f   : > { %v938_v52 = vrot.slane %v935_v50, 1 }
 0x231   : > { %v940_v56 = vmax.f32 %v935_v50, %v938_v52 }
 0x233   : > { %v946_v57 = vrot.slane %v940_v56, 1  ;;  %v929_v58 = vpop.permute.xlu1 %928  ;;  %v948_v61 = vrot.slane %v940_v56, 2  ;;  %v950_v4 = vrot.slane %v940_v56, 3 }
 0x234   : > { %v934_v59 = vsel %vm932_vm9, %v929_v58, 0.0 }
 0x235   : > { %v936_v62 = vmax.f32 %v923_v25, %v934_v59  ;;  %v962_v63 = vsel %vm528_vm3, %v940_v56, %v946_v57 }
 0x236   : > { %v964_v2 = vsel %vm963_vm10, %v962_v63, %v948_v61 }
 0x237   : > { %v942_v0 = vrot.slane %v936_v62, 1  ;;  %v966_v8 = vsel %vm965_vm11, %v964_v2, %v950_v4  ;;  %v2446_v4 = vld [vmem:[#allocation6 + $0x38] sm:$0xff] }
 0x238   : > { %1722 = vmatpush.bf16.msra.mxu3 %v2446_v4 }
 0x239   : > { %v944_v3 = vmax.f32 %v936_v62, %v942_v0 }
 0x23b   : > { %v953_v5 = vrot.slane %v944_v3, 4  ;;  %v955_v7 = vrot.slane %v944_v3, 5  ;;  %v957_v9 = vrot.slane %v944_v3, 6  ;;  %v959_v11 = vrot.slane %v944_v3, 7  ;;  %v2454_v3 = vld [vmem:[#allocation6 + $0x78] sm:$0xff] }
 0x23c   : > { %1735 = vmatpush.bf16.msrb.mxu1 %v2454_v3 }
 0x23d   : > { %v968_v10 = vsel %vm967_vm12, %v966_v8, %v953_v5  ;;  %v2462_v5 = vld [vmem:[#allocation6 + $0xb8] sm:$0xff]  ;;  %v2445_v8 = vld [vmem:[#allocation6 + $0x30] sm:$0xff] }
 0x23e   : > { %v970_v12 = vsel %vm969_vm13, %v968_v10, %v955_v7  ;;  %v2453_v7 = vld [vmem:[#allocation6 + $0x70] sm:$0xff]  ;;  %v2452_v10 = vld [vmem:[#allocation6 + $0x68] sm:$0xff]  ;;  %1723 = vmatpush.bf16.msra.mxu3 %v2445_v8 }
 0x23f   : > { %v972_v13 = vsel %vm971_vm14, %v970_v12, %v957_v9  ;;  %v2461_v9 = vld [vmem:[#allocation6 + $0xb0] sm:$0xff]  ;;  %v2451_v12 = vld [vmem:[#allocation6 + $0x60] sm:$0xff] }
 0x240   : > { %v974_v14 = vsel %vm973_vm15, %v972_v13, %v959_v11  ;;  %1736 = vmatpush.bf16.msrb.mxu1 %v2453_v7  ;;  %v2450_v13 = vld [vmem:[#allocation6 + $0x58] sm:$0xff] }
 0x241   : > { %v975_v15 = vpack.c.bf16 %v974_v14, %v974_v14 }
 0x243   : > { %v977_v16 = vunpack.c.l.b16 %v975_v15  ;;  %1212 = vmatmul.bf16.vlgmr.msrb.gmra.mxu2 %v975_v15  ;;  %v2511_v15 = vld [vmem:[%s2933_s8] ss:$0 sm:$0xff] }
 0x244   : > { %1737 = vmatpush.bf16.msrb.mxu1 %v2452_v10 }
 0x245   : > { %v978_v17 = vpack.c.b16 %v977_v16, %v977_v16 }
 0x247   : > { %v980_v18 = vshrl.u32 %v978_v17, 16  ;;  %v983_v19 = vshll.u32 %v978_v17, 16 }
 0x248   : > { %1738 = vmatpush.bf16.msrb.mxu1 %v2451_v12 }
 0x249   : > { %v982_v6 = vrot.slane %v980_v18, 7  ;;  %v988_v20 = vrot.slane %v983_v19, 1 }
 0x24b   : > { %v985_v22 = vor.u32 %v983_v19, %v982_v6  ;;  %v989_v23 = vor.u32 %v988_v20, %v980_v18 }
 0x24c   : > { %1739 = vmatpush.bf16.msrb.mxu1 %v2450_v13 }
 0x24d   : > { %v987_v25 = vsel %vm2795_vm5, 0, %v985_v22  ;;  %v994_v26 = vsel %vm2886_vm1, %v989_v23, 0  ;;  %v2444_v23 = vld [vmem:[#allocation6 + $0x28] sm:$0xff] }
 0x24e   : > { %1199 = vmatmul.bf16.vlgmr.msrb.gmra.mxu0 %v987_v25  ;;  %1225 = vmatmul.bf16.vlgmr.msrb.gmra.mxu3 %v994_v26  ;;  %v2460_v25 = vld [vmem:[#allocation6 + $0xa8] sm:$0xff]  ;;  %v2449_v26 = vld [vmem:[#allocation6 + $0x50] sm:$0xff] }
 0x24f   : > { %1748 = vmatpush.bf16.msrb.mxu0 %v2462_v5  ;;  %1724 = vmatpush.bf16.msra.mxu3 %v2444_v23 }
 0x250   : > { %1740 = vmatpush.bf16.msrb.mxu1 %v2449_v26 }
 0x253   : > { %1749 = vmatpush.bf16.msrb.mxu0 %v2461_v9  ;;  %1725 = vmatpush.bf16.msra.mxu3 %v2443_v27 }
 0x254   : > { %1741 = vmatpush.bf16.msrb.mxu1 %v2448_v29 }
 0x257   : > { %1750 = vmatpush.bf16.msrb.mxu0 %v2460_v25  ;;  %1726 = vmatpush.bf16.msra.mxu3 %v2442_v30 }
 0x258   : > { %1742 = vmatpush.bf16.msrb.mxu1 %v2447_v32 }
 0x25b   : > { %1751 = vmatpush.bf16.msrb.mxu0 %v2459_v28  ;;  %1727 = vmatpush.bf16.msra.mxu3 %v2441_v33 }
 0x25f   : > { %1752 = vmatpush.bf16.msrb.mxu0 %v2458_v31  ;;  %1728 = vmatpush.bf16.msra.mxu3 %v2440_v35 }
 0x263   : > { %1753 = vmatpush.bf16.msrb.mxu0 %v2457_v34  ;;  %1729 = vmatpush.bf16.msra.mxu3 %v2439_v37 }
 0x267   : > { %1754 = vmatpush.bf16.msrb.mxu0 %v2456_v36 }
 0x26b   : > { %1755 = vmatpush.bf16.msrb.mxu0 %v2455_v38 }
 0x2c6   : > { %v1213_v45 = vpop.f32.mrf.mxu2 }
 0x2cb   : > { %v1200_v47 = vpop.f32.mrf.mxu0 }
 0x2cc   : > { %v1201_v48 = vadd.f32 %v2510_v46, %v1200_v47 }
 0x2ce   : > { %v1215_v49 = vpop.f32.mrf.mxu2  ;;  %v1214_v50 = vadd.f32 %v1213_v45, %v1201_v48 }
 0x2d1   : > { %v1226_v51 = vpop.f32.mrf.mxu3 }
 0x2d2   : > { %v1227_v52 = vadd.f32 %v1226_v51, %v1214_v50 }
 0x2d3   : > { %v1202_v53 = vpop.f32.mrf.mxu0 }
 0x2d4   : > { %v1230_v54 = vmax.f32 %v1227_v52, 0.0 }
 0x2d6   : > { %1231 = vst [vmem:[%s507_s30] sm:$0xff] %v1230_v54  ;;  %v1232_v55 = vpack.c.bf16 %v1230_v54, %v1230_v54 }
 0x2d8   : > { %v1234_v56 = vunpack.c.l.b16 %v1232_v55  ;;  %1466 = vmatmul.bf16.vlgmr.msra.gmra.mxu0 %v1232_v55 }
 0x2d9   : > { %v1228_v57 = vpop.f32.mrf.mxu3 }
 0x2da   : > { %v1235_v58 = vpack.c.b16 %v1234_v56, %v1234_v56 }
 0x2dc   : > { %v1237_v59 = vshrl.u32 %v1235_v58, 16  ;;  %v1240_v60 = vshll.u32 %v1235_v58, 16 }
 0x2de   : > { %v1239_v61 = vrot.slane %v1237_v59, 7  ;;  %v1245_v62 = vrot.slane %v1240_v60, 1 }
 0x2e0   : > { %v1242_v63 = vor.u32 %v1240_v60, %v1239_v61  ;;  %v1246_v0 = vor.u32 %v1245_v62, %v1237_v59 }
 0x2e2   : > { %v1244_v1 = vsel %vm2795_vm5, 0, %v1242_v63  ;;  %v1248_v2 = vsel %vm2886_vm1, %v1246_v0, 0  ;;  %v2512_v0 = vld [vmem:[%s2935_s10] ss:$0 sm:$0xff] }
 0x2e3   : > { %1453 = vmatmul.bf16.vlgmr.msra.gmra.mxu1 %v1244_v1  ;;  %1479 = vmatmul.bf16.vlgmr.msra.gmra.mxu2 %v1248_v2 }
 0x355   : > { %v1467_v11 = vpop.f32.mrf.mxu0 }
 0x35d   : > { %v1469_v14 = vpop.f32.mrf.mxu0 }
 0x360   : > { %v1454_v16 = vpop.f32.mrf.mxu1 }
 0x361   : > { %v1455_v17 = vadd.f32 %v2511_v15, %v1454_v16 }
 0x363   : > { %v1468_v18 = vadd.f32 %v1467_v11, %v1455_v17 }
 0x366   : > { %v1480_v19 = vpop.f32.mrf.mxu2 }
 0x367   : > { %v1481_v6 = vadd.f32 %v1480_v19, %v1468_v18 }
 0x368   : > { %v1456_v20 = vpop.f32.mrf.mxu1 }
 0x369   : > { %v1484_v21 = vmax.f32 %v1481_v6, 0.0 }
 0x36b   : > { %1486 = vrot.lane.b32.xlu2 %v1484_v21, %s2627_s16 }
 0x36e   : > { %v1482_v22 = vpop.f32.mrf.mxu2 }
 0x3c5   : > { %v1487_v39 = vpop.permute.xlu2 %1486 }
 0x3c6   : > { %v1490_v40 = vsel %vm1489_vm2, %v1487_v39, 0.0 }
 0x3c7   : > { %v1491_v41 = vmax.f32 %v1484_v21, %v1490_v40 }
 0x3c9   : > { %v1493_v42 = vrot.slane %v1491_v41, 1 }
 0x3cb   : > { %v1495_v43 = vmax.f32 %v1491_v41, %v1493_v42 }
 0x3cd   : > { %v1497_v44 = vrot.slane %v1495_v43, 1  ;;  %v1499_v45 = vrot.slane %v1495_v43, 2  ;;  %v1501_v46 = vrot.slane %v1495_v43, 3 }
 0x3cf   : > { %v1503_v47 = vsel %vm528_vm3, %v1495_v43, %v1497_v44 }
 0x3d0   : > { %v1504_v48 = vsel %vm963_vm10, %v1503_v47, %v1499_v45 }
 0x3d1   : > { %v1505_v49 = vsel %vm965_vm11, %v1504_v48, %v1501_v46 }
 0x3d2   : > { %v1506_v50 = vpack.c.bf16 %v1505_v49, %v1505_v49 }
 0x3d4   : > { %v1508_v51 = vunpack.c.l.b16 %v1506_v50  ;;  %1743 = vmatmul.bf16.vlgmr.msrb.gmra.mxu1 %v1506_v50 }
 0x3d6   : > { %v1509_v52 = vpack.c.b16 %v1508_v51, %v1508_v51 }
 0x3d8   : > { %v1511_v53 = vshrl.u32 %v1509_v52, 16  ;;  %v1514_v54 = vshll.u32 %v1509_v52, 16 }
 0x3da   : > { %v1513_v55 = vrot.slane %v1511_v53, 7  ;;  %v1519_v56 = vrot.slane %v1514_v54, 1 }
 0x3dc   : > { %v1516_v57 = vor.u32 %v1514_v54, %v1513_v55  ;;  %v1520_v58 = vor.u32 %v1519_v56, %v1511_v53 }
 0x3de   : > { %v1518_v59 = vsel %vm2795_vm5, 0, %v1516_v57  ;;  %v1525_v60 = vsel %vm1524_vm6, %v1520_v58, 0 }
 0x3df   : > { %1730 = vmatmul.bf16.vlgmr.msra.gmra.mxu3 %v1518_v59  ;;  %1756 = vmatmul.bf16.vlgmr.msrb.gmra.mxu0 %v1525_v60 }
 0x451   : > { %v1744_v61 = vpop.f32.mrf.mxu1 }
 0x459   : > { %v1746_v62 = vpop.f32.mrf.mxu1 }
 0x45c   : > { %v1757_v63 = vpop.f32.mrf.mxu0 }
 0x462   : > { %v1731_v1 = vpop.f32.mrf.mxu3 }
 0x463   : > { %v1732_v2 = vadd.f32 %v2512_v0, %v1731_v1 }
 0x464   : > { %v1759_v3 = vpop.f32.mrf.mxu0 }
 0x465   : > { %v1745_v4 = vadd.f32 %v1744_v61, %v1732_v2 }
 0x467   : > { %v1758_v5 = vadd.f32 %v1757_v63, %v1745_v4 }
 0x469   : > { %v1761_v24 = vmax.f32 %v1758_v5, 0.0 }
 0x46a   : > { %v1733_v7 = vpop.f32.mrf.mxu3 }
 0x46b   : > { %1762 = vst [vmem:[%s511_s22] sm:$0xf] %v1761_v24 }
 0x46c PF: > { %s26_s25 = sadd.s32 1, %s2617_s25  }
 0x46d   : > { %p23_p7 = scmp.ge.s32.totalorder %s26_s25, 4  }
 0x46f   :  { %25 = sbr.rel (!%p23_p7) target bundleno = 2 (0x2), region = 131 }
 0x474   :  { %1812 = vsyncpa [#allocation3], 1 }
 0x475   :  { %1814 = vsyncpa [#allocation3 + $0x1], 1 }
 0x476   :  { %1815 = vsyncpa [#allocation5], 1 }

</bundles_post_ra>
